<compile_context>
chip_gen: v6e
topology: v6e:2x2x1
jax: 0.10.0
libtpu: 0.0.40
codegen_flags: <defaults>
</compile_context>

<pallas_src>
from functools import partial

import jax
import jax.numpy as jnp
from jax import lax
from jax.experimental import pallas as pl
from jax.experimental.pallas import tpu as pltpu


def _layernorm_kernel(x_ref, w_ref, b_ref, o_ref, *, bias_free, eps):
    # x_ref: (C, T) tile — channels on sublanes, spatial positions on lanes.
    x = x_ref[...].astype(jnp.float32)                       # (C, T)
    inv_c = 1.0 / x.shape[0]

    # Per-spatial-position statistics over the channel (sublane) axis.
    mu = jnp.sum(x, axis=0, keepdims=True) * inv_c           # (1, T)
    xc = x - mu
    var = jnp.sum(xc * xc, axis=0, keepdims=True) * inv_c    # (1, T)
    inv_sigma = lax.rsqrt(var + eps)                         # (1, T), EUP

    if bias_free:
        y = x * inv_sigma * w_ref[...]                       # (C, T)
    else:
        y = xc * inv_sigma * w_ref[...] + b_ref[...]         # (C, T)

    o_ref[...] = y.astype(o_ref.dtype)


def _pick_hw_tile(hw, c, dtype_bytes, vmem_budget_bytes=24 * 1024 * 1024):
    """Largest HW tile (multiple of 128 dividing hw, or hw itself) such that
    ~4 double-buffered (c, tile) blocks fit a conservative VMEM budget sized
    against v7x's 64 MiB per-TC VMEM."""
    per_lane_bytes = 4 * c * dtype_bytes   # 2 (in+out) x 2 (double buffer)
    max_tile = max(128, vmem_budget_bytes // per_lane_bytes)
    if hw <= max_tile:
        return hw
    t = (max_tile // 128) * 128
    while t >= 128:
        if hw % t == 0:
            return t
        t -= 128
    return hw   # fallback: whole extent (divisibility not achievable)


def layer_norm(x_nchw, weight, bias=None, *, eps=1e-5):
    """LayerNorm over channels of an NCHW tensor.

    bias=None  -> BiasFree_LayerNorm
    bias given -> WithBias_LayerNorm
    """
    n, c, h, w = x_nchw.shape
    hw = h * w
    bias_free = bias is None

    x_flat = x_nchw.reshape(n, c, hw)
    w2d = weight.astype(jnp.float32).reshape(c, 1)
    b2d = (jnp.zeros((c, 1), jnp.float32) if bias_free
           else bias.astype(jnp.float32).reshape(c, 1))

    dtype_bytes = jnp.dtype(x_nchw.dtype).itemsize
    hw_tile = _pick_hw_tile(hw, c, dtype_bytes)
    hw_blocks = hw // hw_tile

    kernel = partial(_layernorm_kernel, bias_free=bias_free, eps=float(eps))

    cost = pl.CostEstimate(
        flops=8 * n * c * hw,                                 # sums/sub/mul/scale
        transcendentals=n * hw,                               # rsqrt per position
        bytes_accessed=2 * n * c * hw * dtype_bytes + 2 * c * 4,
    )

    out_flat = pl.pallas_call(
        kernel,
        out_shape=jax.ShapeDtypeStruct((n, c, hw), x_nchw.dtype),
        grid_spec=pltpu.PrefetchScalarGridSpec(
            num_scalar_prefetch=0,
            grid=(n, hw_blocks),
            in_specs=[
                pl.BlockSpec((None, c, hw_tile), lambda i, j: (i, 0, j)),  # x
                pl.BlockSpec((c, 1), lambda i, j: (0, 0)),                 # weight
                pl.BlockSpec((c, 1), lambda i, j: (0, 0)),                 # bias
            ],
            out_specs=pl.BlockSpec((None, c, hw_tile), lambda i, j: (i, 0, j)),
        ),
        compiler_params=pltpu.CompilerParams(
            dimension_semantics=("parallel", "parallel")),
        cost_estimate=cost,
    )(x_flat, w2d, b2d)

    return out_flat.reshape(n, c, h, w)


def layer_norm_ref(x, weight, bias=None, eps=1e-5):
    """Pure-JAX reference mirroring the PyTorch module (to_3d -> LN(C) -> to_4d)."""
    mu = jnp.mean(x, axis=1, keepdims=True)
    var = jnp.mean((x - mu) ** 2, axis=1, keepdims=True)
    inv = 1.0 / jnp.sqrt(var + eps)
    w = weight.reshape(1, -1, 1, 1)
    if bias is None:                      # BiasFree
        return x * inv * w
    return (x - mu) * inv * w + bias.reshape(1, -1, 1, 1)   # WithBias


if __name__ == "__main__":
    # Small shapes consistent with the module: batch=2, channels=4, spatial=16.
    N, C, H, W = 2, 4, 16, 16

    key = jax.random.PRNGKey(0)
    kx, kw, kb = jax.random.split(key, 3)

    x = jax.random.normal(kx, (N, C, H, W), dtype=jnp.float32)
    weight = 1.0 + 0.1 * jax.random.normal(kw, (C,), dtype=jnp.float32)
    bias = 0.05 * jax.random.normal(kb, (C,), dtype=jnp.float32)

    out_withbias = layer_norm(x, weight, bias)   # WithBias_LayerNorm path
    out_biasfree = layer_norm(x, weight, None)   # BiasFree_LayerNorm path
    jax.block_until_ready((out_withbias, out_biasfree))

    ref_withbias = layer_norm_ref(x, weight, bias)
    ref_biasfree = layer_norm_ref(x, weight, None)

    assert out_withbias.shape == (N, C, H, W)
    assert out_biasfree.shape == (N, C, H, W)
    assert jnp.allclose(out_withbias, ref_withbias, atol=1e-5, rtol=1e-5), \
        "WithBias mismatch vs reference"
    assert jnp.allclose(out_biasfree, ref_biasfree, atol=1e-5, rtol=1e-5), \
        "BiasFree mismatch vs reference"

    print("KERNEL_OK")
</pallas_src>

<mosaic_0001>
module attributes {stable_mosaic.version = 11 : i64} {
  func.func @_layernorm_kernel(%arg0: i32, %arg1: i32, %arg2: memref<1x4x256xf32, #tpu.memory_space<vmem>>, %arg3: memref<4x1xf32, #tpu.memory_space<vmem>>, %arg4: memref<4x1xf32, #tpu.memory_space<vmem>>, %arg5: memref<1x4x256xf32, #tpu.memory_space<vmem>>) attributes {dimension_semantics = [#tpu.dimension_semantics<parallel>, #tpu.dimension_semantics<parallel>], iteration_bounds = array<i64: 2, 1>, scalar_prefetch = 0 : i64, scratch_operands = 0 : i64, tpu.core_type = #tpu.core_type<tc>, window_params = [{transform_indices = @transform_0, window_bounds = array<i64: 1, 4, 256>}, {pipeline_mode = #tpu.pipeline_mode<synchronous>, transform_indices = @transform_1, window_bounds = array<i64: 4, 1>}, {pipeline_mode = #tpu.pipeline_mode<synchronous>, transform_indices = @transform_2, window_bounds = array<i64: 4, 1>}, {transform_indices = @transform_3, window_bounds = array<i64: 1, 4, 256>}]} {
    %c0 = arith.constant 0 : index
    %c0_0 = arith.constant 0 : index
    %c0_1 = arith.constant 0 : index
    %0 = vector.load %arg2[%c0, %c0_0, %c0_1] : memref<1x4x256xf32, #tpu.memory_space<vmem>>, vector<1x4x256xf32>
    %1 = vector.shape_cast %0 : vector<1x4x256xf32> to vector<4x256xf32>
    %cst = arith.constant dense<0.000000e+00> : vector<256xf32>
    %2 = vector.multi_reduction <add>, %1, %cst [0] : vector<4x256xf32> to vector<256xf32>
    %3 = vector.shape_cast %2 : vector<256xf32> to vector<1x256xf32>
    %cst_2 = arith.constant 2.500000e-01 : f32
    %4 = vector.broadcast %cst_2 : f32 to vector<1x256xf32>
    %5 = arith.mulf %3, %4 : vector<1x256xf32>
    %6 = vector.broadcast %5 : vector<1x256xf32> to vector<4x256xf32>
    %7 = arith.subf %1, %6 : vector<4x256xf32>
    %8 = arith.mulf %7, %7 : vector<4x256xf32>
    %cst_3 = arith.constant dense<0.000000e+00> : vector<256xf32>
    %9 = vector.multi_reduction <add>, %8, %cst_3 [0] : vector<4x256xf32> to vector<256xf32>
    %10 = vector.shape_cast %9 : vector<256xf32> to vector<1x256xf32>
    %cst_4 = arith.constant 2.500000e-01 : f32
    %11 = vector.broadcast %cst_4 : f32 to vector<1x256xf32>
    %12 = arith.mulf %10, %11 : vector<1x256xf32>
    %cst_5 = arith.constant 9.99999974E-6 : f32
    %13 = vector.broadcast %cst_5 : f32 to vector<1x256xf32>
    %14 = arith.addf %12, %13 : vector<1x256xf32>
    %15 = math.rsqrt %14 : vector<1x256xf32>
    %16 = vector.broadcast %15 : vector<1x256xf32> to vector<4x256xf32>
    %17 = arith.mulf %7, %16 : vector<4x256xf32>
    %c0_6 = arith.constant 0 : index
    %c0_7 = arith.constant 0 : index
    %18 = vector.load %arg3[%c0_6, %c0_7] : memref<4x1xf32, #tpu.memory_space<vmem>>, vector<4x1xf32>
    %19 = vector.broadcast %18 : vector<4x1xf32> to vector<4x256xf32>
    %20 = arith.mulf %17, %19 : vector<4x256xf32>
    %c0_8 = arith.constant 0 : index
    %c0_9 = arith.constant 0 : index
    %21 = vector.load %arg4[%c0_8, %c0_9] : memref<4x1xf32, #tpu.memory_space<vmem>>, vector<4x1xf32>
    %22 = vector.broadcast %21 : vector<4x1xf32> to vector<4x256xf32>
    %23 = arith.addf %20, %22 : vector<4x256xf32>
    %c0_10 = arith.constant 0 : index
    %c0_11 = arith.constant 0 : index
    %c0_12 = arith.constant 0 : index
    %24 = vector.load %arg5[%c0_10, %c0_11, %c0_12] : memref<1x4x256xf32, #tpu.memory_space<vmem>>, vector<1x4x256xf32>
    %25 = vector.shape_cast %24 : vector<1x4x256xf32> to vector<4x256xf32>
    %26 = vector.shape_cast %23 : vector<4x256xf32> to vector<1x4x256xf32>
    tpu.vector_store %arg5[%c0_10, %c0_11, %c0_12], %26 {strides = array<i32>} : memref<1x4x256xf32, #tpu.memory_space<vmem>>, vector<1x4x256xf32>,
    return
  }
  func.func @transform_0(%arg0: i32, %arg1: i32) -> (i32, i32, i32) {
    %c0_i32 = arith.constant 0 : i32
    %c0_i32_0 = arith.constant 0 : i32
    return %arg0, %c0_i32, %arg1 : i32, i32, i32
  }
  func.func @transform_1(%arg0: i32, %arg1: i32) -> (i32, i32) {
    %c0_i32 = arith.constant 0 : i32
    %c0_i32_0 = arith.constant 0 : i32
    %c0_i32_1 = arith.constant 0 : i32
    return %c0_i32, %c0_i32_0 : i32, i32
  }
  func.func @transform_2(%arg0: i32, %arg1: i32) -> (i32, i32) {
    %c0_i32 = arith.constant 0 : i32
    %c0_i32_0 = arith.constant 0 : i32
    %c0_i32_1 = arith.constant 0 : i32
    return %c0_i32, %c0_i32_0 : i32, i32
  }
  func.func @transform_3(%arg0: i32, %arg1: i32) -> (i32, i32, i32) {
    %c0_i32 = arith.constant 0 : i32
    %c0_i32_0 = arith.constant 0 : i32
    return %arg0, %c0_i32, %arg1 : i32, i32, i32
  }
}

</mosaic_0001>

<bundles_post_ra>
// kernel: tpu_custom_call.1
= control target key start
LH: loop header
LB: loop body
LE: loop exit
PB: predicated region body
PF: predicated region fallthrough
CT: control target
= control target key end

     0   :  { %8 = vsyncpa [#allocation3], 0  ;;  %s761_s0 = inlined_call_operand.hbm [shape: f32[2,4,256], index: 0, kind: input, shape index: {}]   ;;  %s762_s1 = inlined_call_operand.vmem [shape: f32[4,1], index: 1, kind: input, shape index: {}]   ;;  %s763_s2 = inlined_call_operand.vmem [shape: f32[4,1], index: 2, kind: input, shape index: {}]   ;;  %s764_s3 = inlined_call_operand.hbm [shape: f32[2,4,256], index: 3, kind: output, shape index: {}]  }
   0x1   :  { %10 = vsyncpa [#allocation3 + $0x1], 0 }
   0x2   :  { %11 = vsyncpa [#allocation4], 0 }
   0x3   :  { %13 = vsyncpa [#allocation4 + $0x1], 0  ;;  %s613_s12 = smov 0   ;;  %s615_s13 = smov 0  }
   0x4   :  { %s617_s14 = smov 0   ;;  %s619_s15 = smov 0  }
   0x5   :  { %s621_s16 = smov 0   ;;  %s623_s17 = smov 0  }
   0x6 LB: > { %s392_s18 = sadd.s32 4294967295, %s587_s17   ;;  %s393_s19 = sadd.s32 4294967294, %s587_s17   ;;  %s587_s17 = sphi %s623_s17, %s19_s17   ;;  %s583_s16 = sphi %s621_s16, %s776_s16   ;;  %s579_s15 = sphi %s619_s15, %s775_s15   ;;  %s575_s14 = sphi %s617_s14, %s774_s14   ;;  %s571_s13 = sphi %s615_s13, %s773_s13   ;;  %s567_s12 = sphi %s613_s12, %s772_s12  }
   0x7   : > { %s31_s20 = sadd.s32 1, %s583_s16  ;;  %s40_s21 = sadd.s32 1, %s575_s14 }
   0x8   : > { %p33_p0 = scmp.ge.s32.totalorder %s31_s20, 2  ;;  %p47_p1 = scmp.ne.s32.totalorder %s575_s14, %s571_s13 }
   0x9   : > { %p48_p2 = scmp.eq.s32.totalorder %s587_s17, 0  ;;  %p53_p3 = scmp.ne.s32.totalorder %s571_s13, %s567_s12 }
   0xa   : > { %s778_s20 = smov (%p33_p0, %s31_s20), 0  ;;  %p54_p5 = scmp.eq.s32.totalorder %s392_s18, 0 }
   0xb   : > { %p654_p4 = por %p48_p2, %p47_p1  ;;  %s35_s23 = ssub.s32 %s583_s16, %s778_s20 }
   0xc   : > { %p121_p6 = scmp.eq.s32.totalorder %s392_s18, 1  ;;  %p38_p7 = scmp.eq.s32.totalorder %s35_s23, 0 }
   0xd   : > { %p660_p8 = por %p54_p5, %p53_p3  ;;  %p127_p10 = scmp.eq.s32.totalorder %s393_s19, 1 }
   0xe   : > { %p664_p9 = por %p121_p6, %p47_p1  ;;  %p421_p13 = scmp.lt.s32.totalorder %s587_s17, 2 }
   0xf   : > { %s669_s26 = scalar_select %p38_p7, %s575_s14, %s40_s21  }
  0x10   : > { %p671_p11 = por %p127_p10, %p53_p3  ;;  %s153_s28 = sand.u32 1, %s575_s14  }
  0x11   : > { %s396_s29 = sshll.u32 %s153_s28, 3  ;;  %s407_s30 = sshll.u32 %s583_s16, 7 }
  0x12   : > { %s768_s27 = scalar_select %p671_p11, 1, 0 }
  0x13   : > { %s165_s6 = scalar_lea.hbm %s761_s0, %s407_s30  ;;  %s157_s7 = scalar_lea.vmem [#allocation2], %s396_s29 }
  0x14   : > { %s167_s8 = sshll.u32 %s157_s7, 4  ;;  %p684_p0 = pnand %p421_p13, %p654_p4  ;;  %s168_s8 = int_to_ptr.vmem [resolvable:$true] %s167_s8 }
  0x15   : > { %p399_p1 = scmp.ge.s32.totalorder %s587_s17, 1  ;;  %p172_p2 = scmp.lt.s32.totalorder %s587_s17, 3 }
  0x16   : > { %s154_s10 = scalar_lea.sflag [#allocation3], %s153_s28  ;;  %p481_p3 = pneg %p684_p0 }
  0x17   : > { %s492_s11 = scalar_lea.vmem %s168_s8, 128  ;;  %s589_s18 = smov [#allocation2]  }
  0x18   : > { %p493_p5 = scmp.ne.s32.totalorder %s168_s8, %s492_s11  ;;  %s497_s19 = sshll.u32 %s589_s18, 4  ;;  %s498_s19 = int_to_ptr.vmem [resolvable:$false] %s497_s19 }
  0x19   : > { %s499_s21 = scalar_lea.vmem %s498_s19, 256  ;;  %p500_p10 = scmp.lt.s32.totalorder %s168_s8, %s498_s19 }
  0x1a   : > { %p495_p6 = pnand %p493_p5, %p481_p3  ;;  %p501_p12 = scmp.lt.s32.totalorder %s499_s21, %s492_s11 }
  0x1c   : > { %p496_p7 = pneg %p495_p6  ;;  %p502_p4 = por %p501_p12, %p500_p10 }
  0x1e   : > { %p503_p13 = pnand %p502_p4, %p496_p7 }
  0x20   : > { %506 = shalt.err (!%p503_p13)
}
  0x21   : > { %416 = dma.hbm_to_vmem [thread:$0]  (!%p684_p0), %s165_s6, 128, %s168_s8, %s154_s10  }
  0x22   : > { %p173_p11 = pnand %p399_p1, %p172_p2 }
  0x23   : > { %s699_s22 = sand.u32 (!%p173_p11), 1, %s571_s13  }
  0x24   : > { %176 = sbr.rel (%p173_p11) target bundleno = 189 (0xbd), region = 32  ;;  %s400_s23 = sshll.u32 (!%p173_p11), %s699_s22, 3 }
  0x25   : > { %s179_s28 = scalar_lea.sflag (!%p173_p11), [#allocation3], %s699_s22  ;;  %s182_s29 = scalar_lea.vmem (!%p173_p11), [#allocation2], %s400_s23 }
  0x29   : > { %558 = dma.done.wait (%p660_p8), %s179_s28, 128  }
  0x2a   : > { %560 = vsyncadd (%p660_p8), %s179_s28, 4294967168  ;;  %v590_v0 = vmov 0   ;;  %v262_v1 = vld [vmem:[%s762_s1] sm:$0xf]  ;;  %vm211_vm0 = vcmask 1043456   ;;  %v270_v45 = vlaneseq  ;;  %s408_s24 = sshll.u32 %s579_s15, 7 }
  0x2b   : > { %473 = vset.pattern.permute.xlu0 %v590_v0  ;;  %v276_v2 = vld [vmem:[%s763_s2] sm:$0xf]  ;;  %v591_v43 = vmov 839922192   ;;  %s204_s7 = scalar_lea.vmem [#allocation5], %s400_s23  ;;  %s306_s11 = scalar_lea.hbm %s764_s3, %s408_s24 }
  0x2c   : > { %265 = vperm.xlu0 %473, %v262_v1   ;;  %v207_v3 = vld [vmem:[%s182_s29] sm:$0xff]  ;;  %v268_v44 = vunpack.c.l.s4 %v591_v43  ;;  %v271_v48 = vshrl.u32 %v270_v45, 7  ;;  %s308_s8 = sshll.u32 %s204_s7, 4  ;;  %s292_s18 = scalar_lea.sflag [#allocation4], %s699_s22  ;;  %s309_s8 = int_to_ptr.vmem [resolvable:$true] %s308_s8 }
  0x2d   : > { %v209_v4 = vcombine.high %v207_v3, %v207_v3  ;;  %v212_v5 = vsel %vm211_vm0, %v207_v3, 0.0  ;;  %s507_s19 = scalar_lea.vmem %s309_s8, 128  ;;  %s592_s21 = smov [#allocation5]  }
  0x2e   : > { %v213_v7 = vrot.slane %v212_v5, 4  ;;  %v269_v47 = vunpack.c.0.s8 %v268_v44  ;;  %p508_p8 = scmp.ne.s32.totalorder %s309_s8, %s507_s19  ;;  %s511_s15 = sshll.u32 %s592_s21, 4  ;;  %s512_s15 = int_to_ptr.vmem [resolvable:$false] %s511_s15 }
  0x2f   : > { %v219_v6 = vsel %vm211_vm0, %v209_v4, 0.0  ;;  %s513_s23 = scalar_lea.vmem %s512_s15, 256  ;;  %p514_p0 = scmp.lt.s32.totalorder %s309_s8, %s512_s15 }
  0x30   : > { %279 = vperm.xlu0 %473, %v276_v2   ;;  %v220_v8 = vrot.slane %v219_v6, 4  ;;  %v214_v9 = vadd.f32 %v213_v7, %v212_v5  ;;  %v272_v50 = vsub.s32 %v269_v47, %v271_v48  ;;  %p509_p11 = pnand %p508_p8, %p664_p9  ;;  %p515_p1 = scmp.lt.s32.totalorder %s513_s23, %s507_s19 }
  0x32   : > { %v221_v10 = vadd.f32 %v220_v8, %v219_v6  ;;  %v215_v11 = vrot.slane %v214_v9, 2  ;;  %p510_p12 = pneg %p509_p11  ;;  %p516_p2 = por %p515_p1, %p514_p0 }
  0x34   : > { %v222_v12 = vrot.slane %v221_v10, 2  ;;  %v216_v13 = vadd.f32 %v215_v11, %v214_v9  ;;  %p517_p3 = pnand %p516_p2, %p510_p12 }
  0x36   : > { %v223_v14 = vadd.f32 %v222_v12, %v221_v10  ;;  %v217_v15 = vrot.slane %v216_v13, 1 }
  0x38   : > { %v224_v16 = vrot.slane %v223_v14, 1  ;;  %v218_v17 = vadd.f32 %v217_v15, %v216_v13 }
  0x3a   : > { %v225_v18 = vadd.f32 %v224_v16, %v223_v14  ;;  %v226_v19 = vmul.f32 0.25, %v218_v17 }
  0x3c   : > { %v227_v20 = vmul.f32 0.25, %v225_v18 }
  0x3e   : > { %v230_v21 = vcombine.low %v226_v19, %v227_v20 }
  0x40   : > { %v232_v22 = vsub.f32 %v207_v3, %v230_v21 }
  0x42   : > { %v233_v23 = vmul.f32 %v232_v22, %v232_v22 }
  0x44   : > { %v235_v24 = vcombine.high %v233_v23, %v233_v23  ;;  %v237_v25 = vsel %vm211_vm0, %v233_v23, 0.0 }
  0x45   : > { %v238_v27 = vrot.slane %v237_v25, 4 }
  0x46   : > { %v244_v26 = vsel %vm211_vm0, %v235_v24, 0.0 }
  0x47   : > { %v245_v28 = vrot.slane %v244_v26, 4  ;;  %v239_v29 = vadd.f32 %v238_v27, %v237_v25 }
  0x49   : > { %v246_v30 = vadd.f32 %v245_v28, %v244_v26  ;;  %v240_v31 = vrot.slane %v239_v29, 2 }
  0x4b   : > { %v247_v32 = vrot.slane %v246_v30, 2  ;;  %v241_v33 = vadd.f32 %v240_v31, %v239_v29 }
  0x4d   : > { %v248_v34 = vadd.f32 %v247_v32, %v246_v30  ;;  %v242_v35 = vrot.slane %v241_v33, 1 }
  0x4f   : > { %v249_v36 = vrot.slane %v248_v34, 1  ;;  %v243_v37 = vadd.f32 %v242_v35, %v241_v33 }
  0x51   : > { %v250_v38 = vadd.f32 %v249_v36, %v248_v34  ;;  %v251_v39 = vmul.f32 0.25, %v243_v37 }
  0x53   : > { %v252_v40 = vmul.f32 0.25, %v250_v38  ;;  %v253_v41 = vadd.f32 1e-05, %v251_v39 }
  0x55   : > { %v254_v42 = vadd.f32 1e-05, %v252_v40  ;;  %475 = vrsqrt.f32 %v253_v41 }
  0x57   : > { %477 = vrsqrt.f32 %v254_v42 }
  0x62   : > { %v476_v46 = vpop.eup %475 }
  0x64   : > { %v478_v49 = vpop.eup %477 }
  0x65   : > { %v259_v51 = vcombine.low %v476_v46, %v478_v49 }
  0x67   : > { %v261_v53 = vmul.f32 %v259_v51, %v232_v22 }
  0xa7   : > { %v266_v52 = vpop.permute.xlu0 %265 }
  0xa8   : > { %v273_v54 = vrot.slane %v266_v52, %v272_v50 }
  0xaa   : > { %v275_v56 = vmul.f32 %v273_v54, %v261_v53 }
  0xab   : > { %v280_v55 = vpop.permute.xlu0 %279 }
  0xac   : > { %v287_v57 = vrot.slane %v280_v55, %v272_v50 }
  0xae   : > { %v289_v58 = vadd.f32 %v287_v57, %v275_v56 }
  0xb0   : > { %290 = vst [vmem:[%s204_s7] sm:$0xff] %v289_v58 }
  0xb1   : > { %520 = shalt.err (!%p517_p3)
}
  0xb2   : > { %s521_s28 = scalar_lea.hbm %s306_s11, 128  ;;  %s525_s30 = scalar_lea.hbm %s764_s3, 256 }
  0xb3   : > { %p522_p5 = scmp.ne.s32.totalorder %s306_s11, %s521_s28  ;;  %p526_p10 = scmp.lt.s32.totalorder %s306_s11, %s764_s3 }
  0xb4   : > { %p527_p4 = scmp.lt.s32.totalorder %s525_s30, %s521_s28 }
  0xb5   : > { %p523_p6 = pnand %p522_p5, %p664_p9 }
  0xb6   : > { %p528_p13 = por %p527_p4, %p526_p10 }
  0xb7   : > { %p524_p7 = pneg %p523_p6 }
  0xb9   : > { %p529_p8 = pnand %p528_p13, %p524_p7 }
  0xbb   : > { %532 = shalt.err (!%p529_p8)
}
  0xbc   : > { %411 = dma.vmem_to_hbm [thread:$0]  (%p664_p9), %s309_s8, 128, %s306_s11, %s292_s18  }
  0xbd PF: > { %s320_s6 = sand.u32 1, %s567_s12   ;;  %p770_p11 = scmp.ne.s32.totalorder %s768_s27, 0 }
  0xbe   : > { %p771_p12 = scmp.ge.s32.totalorder %s587_s17, 2  ;;  %s321_s24 = scalar_lea.sflag [#allocation4], %s320_s6 }
  0xc0   : > { %p418_p0 = pnand %p771_p12, %p770_p11 }
  0xc2   : > { %p419_p1 = pneg %p418_p0 }
  0xc4   : > { %562 = dma.done.wait (%p419_p1), %s321_s24, 128  }
  0xc5   : > { %564 = vsyncadd (%p419_p1), %s321_s24, 4294967168  ;;  %s19_s17 = sadd.s32 1, %s587_s17   ;;  %s772_s12 = smov %s571_s13 }
  0xc6   : > { %p16_p2 = scmp.ge.s32.totalorder %s19_s17, 4   ;;  %s773_s13 = smov %s575_s14 }
  0xc7   : > { %s774_s14 = smov %s669_s26  ;;  %s775_s15 = smov %s583_s16 }
  0xc8   : > { %s776_s16 = smov %s778_s20  ;;  %18 = sbr.rel (!%p16_p2) target bundleno = 6 (0x6), region = 77 }
  0xcd   :  { %326 = vsyncpa [#allocation3], 1 }
  0xce   :  { %328 = vsyncpa [#allocation3 + $0x1], 1 }
  0xcf   :  { %329 = vsyncpa [#allocation4], 1 }
  0xd0   :  { %331 = vsyncpa [#allocation4 + $0x1], 1 }

</bundles_post_ra>
